<compile_context>
chip_gen: v7x
topology: tpu7x:2x2x1
jax: 0.10.0
libtpu: 0.0.40
codegen_flags: <defaults>
</compile_context>

<pallas_src>
import functools
import math

import jax
import jax.numpy as jnp
from jax.experimental import pallas as pl
from jax.experimental.pallas import tpu as pltpu


def _gaussian_1d(size, sigma):
    """Normalized 1-D Gaussian taps; outer product of two of these equals the module's 2-D kernel."""
    coords = jnp.arange(size, dtype=jnp.float32)
    mean = (size - 1) / 2.0
    g = (1.0 / (sigma * math.sqrt(2.0 * math.pi))) * jnp.exp(-(((coords - mean) / sigma) ** 2) / 2.0)
    return (g / jnp.sum(g)).astype(jnp.float32)


def make_gaussian_weight_2d(channels, kernel_size, sigma, dtype=jnp.float32):
    """Reproduce GaussianSmoothing.__init__ weight construction exactly (dim=2). Used for the reference."""
    ks = [int(kernel_size)] * 2
    sg = [float(sigma)] * 2
    grids = jnp.meshgrid(*[jnp.arange(s, dtype=jnp.float32) for s in ks], indexing="ij")
    kernel = jnp.ones((), dtype=jnp.float32)
    for size, std, mgrid in zip(ks, sg, grids):
        mean = (size - 1) / 2
        kernel = kernel * (1.0 / (std * math.sqrt(2 * math.pi))
                           * jnp.exp(-(((mgrid - mean) / std) ** 2) / 2))
    kernel = kernel / jnp.sum(kernel)
    kernel = kernel.reshape((1, 1) + tuple(ks))
    kernel = jnp.tile(kernel, (channels, 1, 1, 1))
    return kernel.astype(dtype)


def _gaussian_smooth_kernel(wv_ref, wh_ref, x_ref, o_ref, xpad_ref, *, K, pad, H_out, W_out):
    # wv_ref, wh_ref: (K,) f32 taps in SMEM (identical for every channel -> no per-step weight DMA)
    # x_ref:          (TP, H, W)           unpadded input planes block (VMEM)
    # o_ref:          (TP, H_out, W_out)   output planes block
    # xpad_ref:       (TP, Hp, Wp) f32     scratch holding the zero-padded planes (fused padding)
    H = x_ref.shape[1]
    W = x_ref.shape[2]

    # 1) Fused zero padding: zero the halo'd scratch and copy the block interior.
    xpad_ref[...] = jnp.zeros_like(xpad_ref)
    xpad_ref[:, pad:pad + H, pad:pad + W] = x_ref[...].astype(jnp.float32)
    xpad = xpad_ref[...]                                   # (TP, Hp, Wp) f32

    # 2) Separable Gaussian: vertical (sublane-axis) pass ...
    tmp = wv_ref[0] * xpad[:, 0:H_out, :]
    for kh in range(1, K):
        tmp = tmp + wv_ref[kh] * xpad[:, kh:kh + H_out, :]  # (TP, H_out, Wp)

    # ... then horizontal (lane-axis) pass, f32 accumulation throughout.
    acc = wh_ref[0] * tmp[:, :, 0:W_out]
    for kw in range(1, K):
        acc = acc + wh_ref[kw] * tmp[:, :, kw:kw + W_out]   # (TP, H_out, W_out)

    o_ref[...] = acc.astype(o_ref.dtype)


def _choose_block_planes(P, Hp, Wp, vmem_budget_bytes=8 << 20):
    """Planes per grid step: as many as comfortably fit VMEM (conservative so it also holds on
    v7x's 64 MiB), but keep >= 2 grid steps when possible so both v7x TensorCores get work."""
    per_plane = Hp * Wp * 4 * 6   # padded f32 scratch + double-buffered in/out blocks + temps
    tp = max(1, min(P, vmem_budget_bytes // per_plane))
    if P >= 2:
        tp = min(tp, max(1, P // 2))
    while P % tp:
        tp -= 1
    return tp


def gaussian_smoothing_pallas(x, channels, kernel_size, sigma):
    """x: (N, C, H, W) NCHW. Matches GaussianSmoothing(channels, kernel_size, sigma, dim=2).forward."""
    del channels  # weight is identical for every channel (module tiles it); taps are shared.
    N, C, H, W = x.shape
    K = int(kernel_size)
    pad = int(0.5 * (K - 1))
    Hp, Wp = H + 2 * pad, W + 2 * pad
    H_out, W_out = Hp - K + 1, Wp - K + 1

    wv = _gaussian_1d(K, float(sigma))   # vertical taps
    wh = _gaussian_1d(K, float(sigma))   # horizontal taps

    P = N * C
    x_planes = x.reshape(P, H, W)        # free reshape (no layout change)

    TP = _choose_block_planes(P, Hp, Wp)
    grid = (P // TP,)

    kernel = functools.partial(_gaussian_smooth_kernel, K=K, pad=pad, H_out=H_out, W_out=W_out)

    out_planes = pl.pallas_call(
        kernel,
        out_shape=jax.ShapeDtypeStruct((P, H_out, W_out), x.dtype),
        grid_spec=pltpu.PrefetchScalarGridSpec(
            num_scalar_prefetch=0,
            grid=grid,
            in_specs=[
                pl.BlockSpec(memory_space=pltpu.MemorySpace.SMEM),   # wv taps (whole array, SMEM)
                pl.BlockSpec(memory_space=pltpu.MemorySpace.SMEM),   # wh taps (whole array, SMEM)
                pl.BlockSpec((TP, H, W), lambda i: (i, 0, 0)),       # block of TP input planes
            ],
            out_specs=pl.BlockSpec((TP, H_out, W_out), lambda i: (i, 0, 0)),
            scratch_shapes=[pltpu.VMEM((TP, Hp, Wp), jnp.float32)],
        ),
        compiler_params=pltpu.CompilerParams(dimension_semantics=("parallel",)),
    )(wv, wh, x_planes)

    return out_planes.reshape(N, C, H_out, W_out)


if __name__ == "__main__":
    # Module config: GaussianSmoothing(channels=4, kernel_size=5, sigma=1.0, dim=2)
    channels, kernel_size, sigma = 4, 5, 1.0
    pad = int(0.5 * (kernel_size - 1))

    key = jax.random.PRNGKey(0)
    x = jax.random.normal(key, (2, channels, 16, 16), dtype=jnp.float32)  # NCHW

    out = gaussian_smoothing_pallas(x, channels, kernel_size, sigma)
    out = jax.block_until_ready(out)

    # Reference: depthwise conv2d with the module's exact (tiled) 2-D weight.
    weight2d = make_gaussian_weight_2d(channels, kernel_size, sigma)
    ref = jax.lax.conv_general_dilated(
        x, weight2d,
        window_strides=(1, 1),
        padding=[(pad, pad), (pad, pad)],
        dimension_numbers=("NCHW", "OIHW", "NCHW"),
        feature_group_count=channels,
    )
    assert out.shape == ref.shape
    max_err = float(jnp.max(jnp.abs(out - ref)))
    assert jnp.allclose(out, ref, atol=1e-5, rtol=1e-5), max_err

    print("KERNEL_OK")
</pallas_src>

<mosaic_0001>
module attributes {stable_mosaic.version = 11 : i64} {
  func.func @_gaussian_smooth_kernel(%arg0: i32, %arg1: memref<5xf32, #tpu.memory_space<smem>>, %arg2: memref<5xf32, #tpu.memory_space<smem>>, %arg3: memref<4x16x16xf32, #tpu.memory_space<vmem>>, %arg4: memref<4x16x16xf32, #tpu.memory_space<vmem>>, %arg5: memref<4x20x20xf32, #tpu.memory_space<vmem>>) attributes {dimension_semantics = [#tpu.dimension_semantics<parallel>], iteration_bounds = array<i64: 2>, scalar_prefetch = 0 : i64, scratch_operands = 1 : i64, tpu.core_type = #tpu.core_type<tc>, window_params = [{transform_indices = @transform_0, window_bounds = array<i64: 5>}, {transform_indices = @transform_1, window_bounds = array<i64: 5>}, {transform_indices = @transform_2, window_bounds = array<i64: 4, 16, 16>}, {transform_indices = @transform_3, window_bounds = array<i64: 4, 16, 16>}]} {
    %cst = arith.constant 0.000000e+00 : f32
    %0 = vector.broadcast %cst : f32 to vector<4x20x20xf32>
    %c0 = arith.constant 0 : index
    %c0_0 = arith.constant 0 : index
    %c0_1 = arith.constant 0 : index
    %1 = vector.load %arg5[%c0, %c0_0, %c0_1] : memref<4x20x20xf32, #tpu.memory_space<vmem>>, vector<4x20x20xf32>
    tpu.vector_store %arg5[%c0, %c0_0, %c0_1], %0 {strides = array<i32>} : memref<4x20x20xf32, #tpu.memory_space<vmem>>, vector<4x20x20xf32>,
    %c0_2 = arith.constant 0 : index
    %c0_3 = arith.constant 0 : index
    %c0_4 = arith.constant 0 : index
    %2 = vector.load %arg3[%c0_2, %c0_3, %c0_4] : memref<4x16x16xf32, #tpu.memory_space<vmem>>, vector<4x16x16xf32>
    %c0_5 = arith.constant 0 : index
    %c2 = arith.constant 2 : index
    %c2_6 = arith.constant 2 : index
    %3 = vector.load %arg5[%c0_5, %c2, %c2_6] : memref<4x20x20xf32, #tpu.memory_space<vmem>>, vector<4x16x16xf32>
    tpu.vector_store %arg5[%c0_5, %c2, %c2_6], %2 {strides = array<i32>} : memref<4x20x20xf32, #tpu.memory_space<vmem>>, vector<4x16x16xf32>,
    %c0_7 = arith.constant 0 : index
    %c0_8 = arith.constant 0 : index
    %c0_9 = arith.constant 0 : index
    %4 = vector.load %arg5[%c0_7, %c0_8, %c0_9] : memref<4x20x20xf32, #tpu.memory_space<vmem>>, vector<4x20x20xf32>
    %c0_10 = arith.constant 0 : index
    %5 = memref.load %arg1[%c0_10] : memref<5xf32, #tpu.memory_space<smem>>
    %6 = vector.extract_strided_slice %4 {offsets = [0, 0, 0], sizes = [4, 16, 20], strides = [1, 1, 1]} : vector<4x20x20xf32> to vector<4x16x20xf32>
    %7 = vector.broadcast %5 : f32 to vector<4x16x20xf32>
    %8 = arith.mulf %7, %6 : vector<4x16x20xf32>
    %c1 = arith.constant 1 : index
    %9 = memref.load %arg1[%c1] : memref<5xf32, #tpu.memory_space<smem>>
    %10 = vector.extract_strided_slice %4 {offsets = [0, 1, 0], sizes = [4, 16, 20], strides = [1, 1, 1]} : vector<4x20x20xf32> to vector<4x16x20xf32>
    %11 = vector.broadcast %9 : f32 to vector<4x16x20xf32>
    %12 = arith.mulf %11, %10 : vector<4x16x20xf32>
    %13 = arith.addf %8, %12 : vector<4x16x20xf32>
    %c2_11 = arith.constant 2 : index
    %14 = memref.load %arg1[%c2_11] : memref<5xf32, #tpu.memory_space<smem>>
    %15 = vector.extract_strided_slice %4 {offsets = [0, 2, 0], sizes = [4, 16, 20], strides = [1, 1, 1]} : vector<4x20x20xf32> to vector<4x16x20xf32>
    %16 = vector.broadcast %14 : f32 to vector<4x16x20xf32>
    %17 = arith.mulf %16, %15 : vector<4x16x20xf32>
    %18 = arith.addf %13, %17 : vector<4x16x20xf32>
    %c3 = arith.constant 3 : index
    %19 = memref.load %arg1[%c3] : memref<5xf32, #tpu.memory_space<smem>>
    %20 = vector.extract_strided_slice %4 {offsets = [0, 3, 0], sizes = [4, 16, 20], strides = [1, 1, 1]} : vector<4x20x20xf32> to vector<4x16x20xf32>
    %21 = vector.broadcast %19 : f32 to vector<4x16x20xf32>
    %22 = arith.mulf %21, %20 : vector<4x16x20xf32>
    %23 = arith.addf %18, %22 : vector<4x16x20xf32>
    %c4 = arith.constant 4 : index
    %24 = memref.load %arg1[%c4] : memref<5xf32, #tpu.memory_space<smem>>
    %25 = vector.extract_strided_slice %4 {offsets = [0, 4, 0], sizes = [4, 16, 20], strides = [1, 1, 1]} : vector<4x20x20xf32> to vector<4x16x20xf32>
    %26 = vector.broadcast %24 : f32 to vector<4x16x20xf32>
    %27 = arith.mulf %26, %25 : vector<4x16x20xf32>
    %28 = arith.addf %23, %27 : vector<4x16x20xf32>
    %c0_12 = arith.constant 0 : index
    %29 = memref.load %arg2[%c0_12] : memref<5xf32, #tpu.memory_space<smem>>
    %30 = vector.extract_strided_slice %28 {offsets = [0, 0, 0], sizes = [4, 16, 16], strides = [1, 1, 1]} : vector<4x16x20xf32> to vector<4x16x16xf32>
    %31 = vector.broadcast %29 : f32 to vector<4x16x16xf32>
    %32 = arith.mulf %31, %30 : vector<4x16x16xf32>
    %c1_13 = arith.constant 1 : index
    %33 = memref.load %arg2[%c1_13] : memref<5xf32, #tpu.memory_space<smem>>
    %34 = vector.extract_strided_slice %28 {offsets = [0, 0, 1], sizes = [4, 16, 16], strides = [1, 1, 1]} : vector<4x16x20xf32> to vector<4x16x16xf32>
    %35 = vector.broadcast %33 : f32 to vector<4x16x16xf32>
    %36 = arith.mulf %35, %34 : vector<4x16x16xf32>
    %37 = arith.addf %32, %36 : vector<4x16x16xf32>
    %c2_14 = arith.constant 2 : index
    %38 = memref.load %arg2[%c2_14] : memref<5xf32, #tpu.memory_space<smem>>
    %39 = vector.extract_strided_slice %28 {offsets = [0, 0, 2], sizes = [4, 16, 16], strides = [1, 1, 1]} : vector<4x16x20xf32> to vector<4x16x16xf32>
    %40 = vector.broadcast %38 : f32 to vector<4x16x16xf32>
    %41 = arith.mulf %40, %39 : vector<4x16x16xf32>
    %42 = arith.addf %37, %41 : vector<4x16x16xf32>
    %c3_15 = arith.constant 3 : index
    %43 = memref.load %arg2[%c3_15] : memref<5xf32, #tpu.memory_space<smem>>
    %44 = vector.extract_strided_slice %28 {offsets = [0, 0, 3], sizes = [4, 16, 16], strides = [1, 1, 1]} : vector<4x16x20xf32> to vector<4x16x16xf32>
    %45 = vector.broadcast %43 : f32 to vector<4x16x16xf32>
    %46 = arith.mulf %45, %44 : vector<4x16x16xf32>
    %47 = arith.addf %42, %46 : vector<4x16x16xf32>
    %c4_16 = arith.constant 4 : index
    %48 = memref.load %arg2[%c4_16] : memref<5xf32, #tpu.memory_space<smem>>
    %49 = vector.extract_strided_slice %28 {offsets = [0, 0, 4], sizes = [4, 16, 16], strides = [1, 1, 1]} : vector<4x16x20xf32> to vector<4x16x16xf32>
    %50 = vector.broadcast %48 : f32 to vector<4x16x16xf32>
    %51 = arith.mulf %50, %49 : vector<4x16x16xf32>
    %52 = arith.addf %47, %51 : vector<4x16x16xf32>
    %c0_17 = arith.constant 0 : index
    %c0_18 = arith.constant 0 : index
    %c0_19 = arith.constant 0 : index
    %53 = vector.load %arg4[%c0_17, %c0_18, %c0_19] : memref<4x16x16xf32, #tpu.memory_space<vmem>>, vector<4x16x16xf32>
    tpu.vector_store %arg4[%c0_17, %c0_18, %c0_19], %52 {strides = array<i32>} : memref<4x16x16xf32, #tpu.memory_space<vmem>>, vector<4x16x16xf32>,
    return
  }
  func.func @transform_0(%arg0: i32) -> i32 {
    %c0_i32 = arith.constant 0 : i32
    %c0_i32_0 = arith.constant 0 : i32
    return %c0_i32 : i32
  }
  func.func @transform_1(%arg0: i32) -> i32 {
    %c0_i32 = arith.constant 0 : i32
    %c0_i32_0 = arith.constant 0 : i32
    return %c0_i32 : i32
  }
  func.func @transform_2(%arg0: i32) -> (i32, i32, i32) {
    %c0_i32 = arith.constant 0 : i32
    %c0_i32_0 = arith.constant 0 : i32
    %c0_i32_1 = arith.constant 0 : i32
    return %arg0, %c0_i32, %c0_i32_0 : i32, i32, i32
  }
  func.func @transform_3(%arg0: i32) -> (i32, i32, i32) {
    %c0_i32 = arith.constant 0 : i32
    %c0_i32_0 = arith.constant 0 : i32
    %c0_i32_1 = arith.constant 0 : i32
    return %arg0, %c0_i32, %c0_i32_0 : i32, i32, i32
  }
}

</mosaic_0001>

<bundles_post_ra>
// kernel: tpu_custom_call.1
= control target key start
LH: loop header
LB: loop body
LE: loop exit
PB: predicated region body
PF: predicated region fallthrough
CT: control target
= control target key end

     0   :  { %8 = vsyncpa [#allocation6], 0  ;;  %s1602_s0 = inlined_call_operand.hbm [shape: f32[5], index: 0, kind: input, shape index: {}]   ;;  %s1603_s1 = inlined_call_operand.vmem [shape: f32[5], index: 1, kind: input, shape index: {}]   ;;  %s1604_s2 = inlined_call_operand.hbm [shape: f32[8,16,16], index: 2, kind: input, shape index: {}]   ;;  %s1605_s3 = inlined_call_operand.hbm [shape: f32[8,16,16], index: 3, kind: output, shape index: {}]  }
   0x1   :  { %9 = vsyncpa [#allocation7], 0 }
   0x2   :  { %10 = vsyncpa [#allocation4], 0 }
   0x3   :  { %12 = vsyncpa [#allocation4 + $0x1], 0 }
   0x4   :  { %13 = vsyncpa [#allocation5], 0 }
   0x5   :  { %15 = vsyncpa [#allocation5 + $0x1], 0  ;;  %s1162_s12 = smov 0   ;;  %s1164_s13 = smov 0  }
   0x6   :  { %s1166_s14 = smov 0   ;;  %s1168_s15 = smov 0  }
   0x7 LB: > { %s1183_s16 = sadd.s32 4294967295, %s1126_s15   ;;  %s885_s17 = sadd.s32 4294967294, %s1126_s15   ;;  %s1126_s15 = sphi %s1168_s15, %s1628_s15   ;;  %s1122_s14 = sphi %s1166_s14, %s1627_s14   ;;  %s1118_s13 = sphi %s1164_s13, %s1626_s13   ;;  %s1114_s12 = sphi %s1162_s12, %s1625_s12  }
   0x8   : > { %s1187_s18 = sadd.s32 1, %s1126_s15   ;;  %s70_s19 = sadd.s32 1, %s1122_s14 }
   0x9   : > { %s67_s20 = ssub.s32 %s1126_s15, %s1187_s18  ;;  %p77_p0 = scmp.ne.s32.totalorder %s1122_s14, %s1118_s13 }
   0xa   : > { %p68_p1 = scmp.eq.s32.totalorder %s67_s20, 0  ;;  %p78_p2 = scmp.eq.s32.totalorder %s1126_s15, 0 }
   0xb   : > { %p83_p3 = scmp.ne.s32.totalorder %s1118_s13, %s1114_s12  ;;  %p1606_p4 = scmp.eq.s32.totalorder %s1183_s16, 0 }
   0xc   : > { %s1199_s21 = scalar_select %p68_p1, %s1122_s14, %s70_s19  }
   0xd   : > { %p1201_p5 = por %p78_p2, %p77_p0  ;;  %p1207_p6 = por %p1606_p4, %p83_p3 }
   0xe   : > { %p107_p7 = scmp.eq.s32.totalorder %s1183_s16, 1  ;;  %p113_p8 = scmp.eq.s32.totalorder %s885_s17, 1 }
   0xf   : > { %s1610_s23 = scalar_select %p1207_p6, 1, 0 }
  0x10   : > { %p886_p9 = scmp.ge.s32.totalorder %s1126_s15, 1  ;;  %p120_p10 = scmp.lt.s32.totalorder %s1126_s15, 3 }
  0x11   : > { %p1214_p11 = por %p107_p7, %p77_p0  ;;  %p1218_p12 = por %p113_p8, %p83_p3 }
  0x12   : > { %p1222_p13 = pnand %p886_p9, %p120_p10  ;;  %p946_p4 = scmp.lt.s32.totalorder %s1126_s15, 2 }
  0x13   : > { %s1611_s24 = scalar_select %p1214_p11, 1, 0 }
  0x14   : > { %s1612_s25 = scalar_select %p1218_p12, 1, 0 }
  0x15   : > { %p929_p2 = pneg %p1222_p13  ;;  %s142_s29 = sshll.u32 %s1603_s1, 4  ;;  %s143_s29 = int_to_ptr.vmem [resolvable:$true] %s142_s29 }
  0x16   : > { %p1614_p0 = scmp.eq.s32.totalorder %s1183_s16, 0  ;;  %p1241_p3 = pnand %p946_p4, %p1201_p5 }
  0x17   : > { %s153_s5 = sand.u32 1, %s1122_s14   ;;  %s994_s8 = scalar_lea.hbm %s1602_s0, 16 }
  0x18   : > { %p1235_p7 = pnand %p929_p2, %p1614_p0  ;;  %p995_p8 = scmp.ne.s32.totalorder %s1602_s0, %s994_s8 }
  0x19   : > { %p1001_p4 = scmp.lt.u32.totalorder %s994_s8, %s1602_s0 }
  0x1a   : > { %p996_p9 = pneg %p1235_p7 }
  0x1c   : > { %p997_p10 = pnand %p996_p9, %p995_p8 }
  0x1e   : > { %p998_p2 = pneg %p997_p10 }
  0x20   : > { %p1003_p5 = pnand %p1001_p4, %p998_p2 }
  0x22   : > { %1006 = shalt.err (!%p1003_p5)
}
  0x23   : > { %s1128_s19 = smov [#allocation3]   ;;  %s1007_s27 = scalar_lea.vmem %s143_s29, 16 }
  0x24   : > { %932 = dma.hbm_to_smem (!%p1235_p7), %s1602_s0, 16, %s1128_s19, [#allocation6]  }
  0x25   : > { %p1008_p0 = scmp.ne.s32.totalorder %s143_s29, %s1007_s27  ;;  %p1015_p11 = scmp.lt.s32.totalorder %s143_s29, %s143_s29 }
  0x26   : > { %p1016_p8 = scmp.lt.s32.totalorder %s1007_s27, %s1007_s27 }
  0x27   : > { %p1010_p1 = pnand %p1008_p0, %p996_p9 }
  0x28   : > { %p1017_p10 = por %p1016_p8, %p1015_p11 }
  0x29   : > { %p1011_p12 = pneg %p1010_p1 }
  0x2b   : > { %p1018_p6 = pnand %p1017_p10, %p1011_p12 }
  0x2d   : > { %1021 = shalt.err (!%p1018_p6)
}
  0x2e   : > { %s1129_s28 = smov [#allocation8]   ;;  %s890_s6 = sshll.u32 %s153_s5, 6 }
  0x2f   : > { %935 = dma.vmem_to_smem (!%p1235_p7), %s143_s29, 16, %s1129_s28, [#allocation7]  }
  0x30   : > { %s914_s7 = sshll.u32 %s1126_s15, 10  ;;  %s157_s11 = scalar_lea.vmem [#allocation9], %s890_s6 }
  0x31   : > { %s1268_s10 = scalar_lea.hbm %s1604_s2, %s914_s7  ;;  %s165_s17 = sshll.u32 %s157_s11, 4  ;;  %s1270_s17 = int_to_ptr.vmem [resolvable:$true] %s165_s17 }
  0x32   : > { %s1272_s30 = scalar_lea.sflag [#allocation4], %s153_s5  ;;  %s1022_s19 = scalar_lea.hbm %s1268_s10, 1024 }
  0x33   : > { %p1023_p6 = scmp.ne.s32.totalorder %s1268_s10, %s1022_s19  ;;  %p1024_p11 = pneg %p1241_p3 }
  0x34   : > { %s1027_s22 = scalar_lea.hbm %s1604_s2, 2048  ;;  %p1028_p7 = scmp.lt.u32.totalorder %s1268_s10, %s1604_s2 }
  0x35   : > { %p1025_p12 = pnand %p1024_p11, %p1023_p6  ;;  %p1029_p9 = scmp.lt.u32.totalorder %s1027_s22, %s1022_s19 }
  0x36   : > { %p1031_p4 = scmp.lt.u32.totalorder %s1022_s19, %s1268_s10 }
  0x37   : > { %p1026_p1 = pneg %p1025_p12  ;;  %p1030_p2 = por %p1029_p9, %p1028_p7 }
  0x39   : > { %p1032_p5 = por %p1031_p4, %p1030_p2 }
  0x3b   : > { %p1033_p0 = pnand %p1032_p5, %p1026_p1 }
  0x3d   : > { %1036 = shalt.err (!%p1033_p0)
}
  0x3e   : > { %s1037_s5 = scalar_lea.vmem %s1270_s17, 1024  ;;  %s1130_s6 = smov [#allocation9]  }
  0x3f   : > { %p1038_p8 = scmp.ne.s32.totalorder %s1270_s17, %s1037_s5  ;;  %s1042_s7 = sshll.u32 %s1130_s6, 4  ;;  %s1043_s7 = int_to_ptr.vmem [resolvable:$false] %s1042_s7 }
  0x40   : > { %s1044_s8 = scalar_lea.vmem %s1043_s7, 2048  ;;  %p1045_p12 = scmp.lt.s32.totalorder %s1270_s17, %s1043_s7 }
  0x41   : > { %p1040_p10 = pnand %p1038_p8, %p1024_p11  ;;  %p1046_p7 = scmp.lt.s32.totalorder %s1044_s8, %s1037_s5 }
  0x43   : > { %p1041_p6 = pneg %p1040_p10  ;;  %p1047_p9 = por %p1046_p7, %p1045_p12 }
  0x45   : > { %p1048_p2 = pnand %p1047_p9, %p1041_p6 }
  0x47   : > { %1051 = shalt.err (!%p1048_p2)
}
  0x48   : > { %s1131_s9 = smov 128   ;;  %s1132_s11 = smov 8  }
  0x49   : > { %939 = dma.hbm_to_vmem [thread:$0]  (!%p1241_p3), %s1268_s10, 1024, %s1270_s17, %s1272_s30, %s1131_s9, %s1131_s9, %s1132_s11  }
  0x4a   : > { %177 = sbr.rel (%p1222_p13) target bundleno = 449 (0x1c1), region = 32  ;;  %p1617_p11 = scmp.eq.s32.totalorder (!%p1222_p13), %s1183_s16, 0 }
  0x51   : > { %1097 = dma.done.wait (%p1617_p11), [#allocation6], 16   ;;  %p1618_p1 = pmov %p1617_p11 }
  0x53   : > { %1099 = vsyncadd (%p1618_p1), [#allocation6], 4294967280  ;;  %p1619_p4 = pmov %p1618_p1 }
  0x54   : > { %p1620_p5 = pmov %p1618_p1 }
  0x55   : > { %1101 = dma.done.wait (%p1619_p4), [#allocation7], 16  }
  0x56   : > { %1103 = vsyncadd (%p1620_p5), [#allocation7], 4294967280  ;;  %s1311_s19 = sand.u32 1, %s1118_s13   ;;  %p1621_p13 = scmp.ne.s32.totalorder %s1610_s23, 0 }
  0x57   : > { %s897_s26 = sshll.u32 %s1311_s19, 6  ;;  %s188_s4 = scalar_lea.sflag [#allocation4], %s1311_s19 }
  0x58   : > { %s1317_s10 = scalar_lea.vmem [#allocation9], %s897_s26 }
  0x59   : > { %1105 = dma.done.wait (%p1621_p13), %s188_s4, 1024  }
  0x5a   : > { %1107 = vsyncadd (%p1621_p13), %s188_s4, 4294966272 }
  0x5b   : > { %196 = sfence }
  0x5c   : > { %v233_v0 = vld [vmem:[%s1317_s10 + $0x10] sm:$0xff]  ;;  %v231_v1 = vld [vmem:[%s1317_s10] sm:$0xff]  ;;  %vm217_vm0 = vcmask 162816   ;;  %s1133_s17 = smov 2   ;;  %vm220_vm1 = vcmask 158720   ;;  %v234_v2 = vld [vmem:[%s1317_s10 + $0x18] sm:$0xff] }
  0x5d   : > { %251 = vrot.lane.b32.xlu1 %v233_v0, %s1133_s17  ;;  %247 = vrot.lane.b32.xlu0 %v231_v1, %s1133_s17  ;;  %v232_v3 = vld [vmem:[%s1317_s10 + $0x8] sm:$0xff]  ;;  %v1134_v4 = vmov 0.0   ;;  %v235_v6 = vld [vmem:[%s1317_s10 + $0x20] sm:$0xff]  ;;  %s899_s23 = sld [smem:[#allocation3 + $0x1]]  ;;  %vm271_vm2 = vcmask 146448   ;;  %s900_s30 = sld [smem:[#allocation3 + $0x2]] }
  0x5e   : > { %222 = vst.msk [vmem:[#allocation2 + $0x18] sm:$0xff] %vm217_vm0, %v1134_v4  ;;  %223 = vst.msk [vmem:[#allocation2 + $0x20] sm:$0xff] %vm217_vm0, %v1134_v4  ;;  %v236_v5 = vld [vmem:[%s1317_s10 + $0x28] sm:$0xff]  ;;  %v238_v7 = vld [vmem:[%s1317_s10 + $0x38] sm:$0xff]  ;;  %s901_s29 = sld [smem:[#allocation3 + $0x3]]  ;;  %s292_s20 = sld [smem:[#allocation3]] }
  0x5f   : > { %218 = vst.msk [vmem:[#allocation2] sm:$0xff] %vm217_vm0, %v1134_v4  ;;  %219 = vst.msk [vmem:[#allocation2 + $0x8] sm:$0xff] %vm217_vm0, %v1134_v4  ;;  %v237_v8 = vld [vmem:[%s1317_s10 + $0x30] sm:$0xff]  ;;  %s902_s22 = sld [smem:[#allocation3 + $0x4]]  ;;  %s903_s27 = sld [smem:[#allocation8 + $0x1]]  ;;  %vm328_vm3 = vcmask 1046528  }
  0x60   : > { %225 = vst.msk [vmem:[#allocation2 + $0x30] sm:$0xff] %vm217_vm0, %v1134_v4  ;;  %226 = vst.msk [vmem:[#allocation2 + $0x38] sm:$0xff] %vm217_vm0, %v1134_v4  ;;  %vm391_vm4 = vcmask 1045504   ;;  %vm454_vm5 = vcmask 1044480   ;;  %vm517_vm6 = vcmask 1043456   ;;  %s1135_s28 = smov 127  }
  0x61   : > { %228 = vst.msk [vmem:[#allocation2 + $0x48] sm:$0xff] %vm217_vm0, %v1134_v4  ;;  %229 = vst.msk [vmem:[#allocation2 + $0x50] sm:$0xff] %vm217_vm0, %v1134_v4  ;;  %253 = vrot.lane.b32.xlu1 %v234_v2, %s1133_s17  ;;  %249 = vrot.lane.b32.xlu0 %v232_v3, %s1133_s17  ;;  %s904_s5 = sld [smem:[#allocation8 + $0x2]]  ;;  %s1136_s6 = smov 126   ;;  %vm764_vm7 = vcmask 130048  }
  0x62   : > { %224 = vst.msk [vmem:[#allocation2 + $0x28] sm:$0xf] %vm220_vm1, %v1134_v4  ;;  %221 = vst.msk [vmem:[#allocation2 + $0x10] sm:$0xf] %vm220_vm1, %v1134_v4  ;;  %s905_s7 = sld [smem:[#allocation8 + $0x3]]  ;;  %s1137_s8 = smov 125  }
  0x63   : > { %227 = vst.msk [vmem:[#allocation2 + $0x40] sm:$0xf] %vm220_vm1, %v1134_v4  ;;  %230 = vst.msk [vmem:[#allocation2 + $0x58] sm:$0xf] %vm220_vm1, %v1134_v4  ;;  %v1335_v13 = vstv %s899_s23  ;;  %v1337_v14 = vstv %s900_s30  ;;  %s906_s9 = sld [smem:[#allocation8 + $0x4]]  ;;  %s1138_s11 = smov 124  }
  0x64   : > { %v1339_v15 = vstv %s901_s29  ;;  %v1341_v16 = vstv %s292_s20  ;;  %s554_s4 = sld [smem:[#allocation8]]  ;;  %s1528_s10 = scalar_lea.vmem [#allocation10], %s897_s26 }
  0x65   : > { %257 = vrot.lane.b32.xlu1 %v236_v5, %s1133_s17  ;;  %255 = vrot.lane.b32.xlu0 %v235_v6, %s1133_s17  ;;  %v1343_v17 = vstv %s902_s22  ;;  %v1347_v22 = vstv %s903_s27  ;;  %s916_s26 = sshll.u32 %s1183_s16, 10  ;;  %s774_s20 = scalar_lea.sflag [#allocation5], %s1311_s19 }
  0x66   : > { %s1554_s29 = scalar_lea.hbm %s1605_s3, %s916_s26  ;;  %p1622_p0 = scmp.ne.s32.totalorder %s1611_s24, 0 }
  0x67   : > { %s1139_s22 = smov [#allocation10]  }
  0x68   : > { %s1056_s27 = sshll.u32 %s1139_s22, 4  ;;  %s1057_s27 = int_to_ptr.vmem [resolvable:$false] %s1056_s27 }
  0x69   : > { %261 = vrot.lane.b32.xlu1 %v238_v7, %s1133_s17  ;;  %259 = vrot.lane.b32.xlu0 %v237_v8, %s1133_s17  ;;  %s788_s17 = sshll.u32 %s1528_s10, 4  ;;  %s1556_s17 = int_to_ptr.vmem [resolvable:$true] %s788_s17 }
  0x6a   : > { %s1052_s16 = scalar_lea.vmem %s1556_s17, 1024  ;;  %p1059_p6 = scmp.lt.s32.totalorder %s1556_s17, %s1057_s27 }
  0x6b   : > { %p1053_p3 = scmp.ne.s32.totalorder %s1556_s17, %s1052_s16 }
  0x6d   : > { %p1054_p8 = pnand %p1053_p3, %p1622_p0 }
  0x6f   : > { %p1055_p10 = pneg %p1054_p8 }
  0xcf   : > { %v252_v9 = vpop.permute.xlu1 %251  ;;  %v248_v10 = vpop.permute.xlu0 %247 }
  0xd0   : > { %274 = vst.msk [vmem:[#allocation2 + $0x1a] sm:$0xff] %vm271_vm2, %v252_v9  ;;  %272 = vst.msk [vmem:[#allocation2 + $0x2] sm:$0xff] %vm271_vm2, %v248_v10 }
  0xd3   : > { %v254_v11 = vpop.permute.xlu1 %253  ;;  %v250_v12 = vpop.permute.xlu0 %249 }
  0xd4   : > { %275 = vst.msk [vmem:[#allocation2 + $0x22] sm:$0xff] %vm271_vm2, %v254_v11  ;;  %273 = vst.msk [vmem:[#allocation2 + $0xa] sm:$0xff] %vm271_vm2, %v250_v12 }
  0xd7   : > { %v258_v18 = vpop.permute.xlu1 %257  ;;  %v256_v19 = vpop.permute.xlu0 %255  ;;  %v280_v20 = vld [vmem:[#allocation2] sm:$0xff]  ;;  %v283_v21 = vld [vmem:[#allocation2 + $0x18] sm:$0xff] }
  0xd8   : > { %277 = vst.msk [vmem:[#allocation2 + $0x3a] sm:$0xff] %vm271_vm2, %v258_v18  ;;  %276 = vst.msk [vmem:[#allocation2 + $0x32] sm:$0xff] %vm271_vm2, %v256_v19  ;;  %v304_v23 = vmul.f32 %v1335_v13, %v280_v20  ;;  %v367_v24 = vmul.f32 %v1337_v14, %v280_v20  ;;  %v430_v25 = vmul.f32 %v1339_v15, %v280_v20 }
  0xd9   : > { %v294_v26 = vmul.f32 %v1341_v16, %v280_v20  ;;  %v493_v27 = vmul.f32 %v1343_v17, %v280_v20  ;;  %v1355_v28 = vmul.f32 %v1341_v16, %v283_v21  ;;  %v1358_v29 = vmul.f32 %v1335_v13, %v283_v21 }
  0xda   : > { %v329_v30 = vrot.slane %v304_v23, 1  ;;  %v392_v31 = vrot.slane %v367_v24, 2  ;;  %v455_v32 = vrot.slane %v430_v25, 3  ;;  %v1361_v33 = vmul.f32 %v1337_v14, %v283_v21 }
  0xdb   : > { %v262_v34 = vpop.permute.xlu1 %261  ;;  %v260_v35 = vpop.permute.xlu0 %259  ;;  %v281_v36 = vld [vmem:[#allocation2 + $0x8] sm:$0xff]  ;;  %v282_v37 = vld [vmem:[#allocation2 + $0x10] sm:$0xf]  ;;  %v518_v38 = vrot.slane %v493_v27, 4  ;;  %v334_v39 = vrot.slane %v1358_v29, 1  ;;  %v1365_v40 = vmul.f32 %v1339_v15, %v283_v21  ;;  %v1368_v41 = vmul.f32 %v1343_v17, %v283_v21  ;;  %v284_v58 = vld [vmem:[#allocation2 + $0x20] sm:$0xff] }
  0xdc   : > { %279 = vst.msk [vmem:[#allocation2 + $0x52] sm:$0xff] %vm271_vm2, %v262_v34  ;;  %278 = vst.msk [vmem:[#allocation2 + $0x4a] sm:$0xff] %vm271_vm2, %v260_v35  ;;  %v295_v42 = vmul.f32 %v1341_v16, %v281_v36  ;;  %v305_v43 = vmul.f32 %v1335_v13, %v281_v36  ;;  %v306_v44 = vmul.f32 %v1335_v13, %v282_v37  ;;  %v285_v63 = vld [vmem:[#allocation2 + $0x28] sm:$0xf] }
  0xdd   : > { %v368_v45 = vmul.f32 %v1337_v14, %v281_v36  ;;  %v369_v46 = vmul.f32 %v1337_v14, %v282_v37  ;;  %v431_v47 = vmul.f32 %v1339_v15, %v281_v36  ;;  %v432_v48 = vmul.f32 %v1339_v15, %v282_v37 }
  0xde   : > { %v494_v49 = vmul.f32 %v1343_v17, %v281_v36  ;;  %v330_v50 = vrot.slane %v305_v43, 1  ;;  %v332_v51 = vrot.slane %v306_v44, 1  ;;  %v495_v53 = vmul.f32 %v1343_v17, %v282_v37 }
  0xdf   : > { %v393_v52 = vrot.slane %v368_v45, 2  ;;  %v395_v54 = vrot.slane %v369_v46, 2  ;;  %v456_v55 = vrot.slane %v431_v47, 3  ;;  %v458_v56 = vrot.slane %v432_v48, 3  ;;  %v287_v44 = vld [vmem:[#allocation2 + $0x38] sm:$0xff] }
  0xe0   : > { %v519_v57 = vrot.slane %v494_v49, 4  ;;  %v333_v59 = vsel %vm328_vm3, %v330_v50, %v332_v51  ;;  %v521_v60 = vrot.slane %v495_v53, 4  ;;  %v331_v61 = vsel %vm328_vm3, %v329_v30, %v330_v50  ;;  %v288_v49 = vld [vmem:[#allocation2 + $0x40] sm:$0xf] }
  0xe1   : > { %v394_v62 = vsel %vm391_vm4, %v392_v31, %v393_v52  ;;  %v358_v0 = vadd.f32 %v333_v59, %v295_v42  ;;  %v396_v1 = vsel %vm391_vm4, %v393_v52, %v395_v54  ;;  %v459_v2 = vsel %vm454_vm5, %v456_v55, %v458_v56 }
  0xe2   : > { %v357_v3 = vadd.f32 %v331_v61, %v294_v26  ;;  %v522_v4 = vsel %vm517_vm6, %v519_v57, %v521_v60  ;;  %v457_v5 = vsel %vm454_vm5, %v455_v32, %v456_v55  ;;  %v520_v6 = vsel %vm517_vm6, %v518_v38, %v519_v57 }
  0xe3   : > { %v297_v7 = vmul.f32 %v1341_v16, %v284_v58  ;;  %v421_v8 = vadd.f32 %v396_v1, %v358_v0  ;;  %v308_v10 = vmul.f32 %v1335_v13, %v284_v58  ;;  %v309_v11 = vmul.f32 %v1335_v13, %v285_v63 }
  0xe4   : > { %v420_v9 = vadd.f32 %v394_v62, %v357_v3  ;;  %v371_v12 = vmul.f32 %v1337_v14, %v284_v58  ;;  %v372_v18 = vmul.f32 %v1337_v14, %v285_v63  ;;  %v434_v19 = vmul.f32 %v1339_v15, %v284_v58 }
  0xe5   : > { %v435_v20 = vmul.f32 %v1339_v15, %v285_v63  ;;  %v484_v21 = vadd.f32 %v459_v2, %v421_v8  ;;  %v335_v24 = vrot.slane %v308_v10, 1  ;;  %v337_v25 = vrot.slane %v309_v11, 1  ;;  %v286_v8 = vld [vmem:[#allocation2 + $0x30] sm:$0xff] }
  0xe6   : > { %v483_v23 = vadd.f32 %v457_v5, %v420_v9  ;;  %v398_v26 = vrot.slane %v371_v12, 2  ;;  %v400_v27 = vrot.slane %v372_v18, 2  ;;  %v461_v30 = vrot.slane %v434_v19, 3 }
  0xe7   : > { %v463_v31 = vrot.slane %v435_v20, 3  ;;  %v1396_v32 = vadd.f32 %v522_v4, %v484_v21  ;;  %v338_v35 = vsel %vm328_vm3, %v335_v24, %v337_v25  ;;  %v497_v36 = vmul.f32 %v1343_v17, %v284_v58 }
  0xe8   : > { %v1398_v34 = vadd.f32 %v520_v6, %v483_v23  ;;  %v360_v37 = vadd.f32 %v338_v35, %v297_v7  ;;  %v401_v38 = vsel %vm391_vm4, %v398_v26, %v400_v27  ;;  %v498_v43 = vmul.f32 %v1343_v17, %v285_v63  ;;  %v290_v23 = vld [vmem:[#allocation2 + $0x50] sm:$0xff] }
  0xe9   : > { %v464_v42 = vsel %vm454_vm5, %v461_v30, %v463_v31  ;;  %v567_v45 = vmul.f32 %v1347_v22, %v1396_v32  ;;  %v524_v47 = vrot.slane %v497_v36, 4  ;;  %v336_v48 = vsel %vm328_vm3, %v334_v39, %v335_v24 }
  0xea   : > { %v566_v46 = vmul.f32 %v1347_v22, %v1398_v34  ;;  %v423_v50 = vadd.f32 %v401_v38, %v360_v37  ;;  %v526_v51 = vrot.slane %v498_v43, 4  ;;  %v359_v52 = vadd.f32 %v336_v48, %v1355_v28  ;;  %v291_v37 = vld [vmem:[#allocation2 + $0x58] sm:$0xf] }
  0xeb   : > { %v397_v53 = vrot.slane %v1361_v33, 2  ;;  %584 = vrot.lane.b32.xlu1 %v567_v45, %s1135_s28  ;;  %v460_v54 = vrot.slane %v1365_v40, 3  ;;  %v523_v55 = vrot.slane %v1368_v41, 4  ;;  %v299_v29 = vmul.f32 %v1341_v16, %v287_v44 }
  0xec   : > { %582 = vrot.lane.b32.xlu0 %v566_v46, %s1135_s28  ;;  %v311_v39 = vmul.f32 %v1335_v13, %v287_v44  ;;  %v486_v56 = vadd.f32 %v464_v42, %v423_v50  ;;  %v527_v57 = vsel %vm517_vm6, %v524_v47, %v526_v51  ;;  %v312_v33 = vmul.f32 %v1335_v13, %v288_v49 }
  0xed   : > { %v399_v28 = vsel %vm391_vm4, %v397_v53, %v398_v26  ;;  %v462_v59 = vsel %vm454_vm5, %v460_v54, %v461_v30  ;;  %v525_v60 = vsel %vm517_vm6, %v523_v55, %v524_v47  ;;  %v374_v62 = vmul.f32 %v1337_v14, %v287_v44 }
  0xee   : > { %v422_v58 = vadd.f32 %v399_v28, %v359_v52  ;;  %v340_v61 = vrot.slane %v311_v39, 1  ;;  %v1425_v40 = vadd.f32 %v527_v57, %v486_v56  ;;  %v342_v41 = vrot.slane %v312_v33, 1 }
  0xef   : > { %v375_v63 = vmul.f32 %v1337_v14, %v288_v49  ;;  %v437_v1 = vmul.f32 %v1339_v15, %v287_v44  ;;  %v438_v2 = vmul.f32 %v1339_v15, %v288_v49  ;;  %v500_v3 = vmul.f32 %v1343_v17, %v287_v44 }
  0xf0   : > { %v485_v0 = vadd.f32 %v462_v59, %v422_v58  ;;  %v569_v4 = vmul.f32 %v1347_v22, %v1425_v40  ;;  %v343_v5 = vsel %vm328_vm3, %v340_v61, %v342_v41  ;;  %v403_v6 = vrot.slane %v374_v62, 2 }
  0xf1   : > { %v405_v7 = vrot.slane %v375_v63, 2  ;;  %v362_v10 = vadd.f32 %v343_v5, %v299_v29  ;;  %v466_v11 = vrot.slane %v437_v1, 3  ;;  %v468_v12 = vrot.slane %v438_v2, 3  ;;  %v289_v63 = vld [vmem:[#allocation2 + $0x48] sm:$0xff] }
  0xf2   : > { %v1435_v9 = vadd.f32 %v525_v60, %v485_v0  ;;  %588 = vrot.lane.b32.xlu1 %v569_v4, %s1135_s28  ;;  %v501_v19 = vmul.f32 %v1343_v17, %v288_v49  ;;  %v529_v20 = vrot.slane %v500_v3, 4  ;;  %v298_v21 = vmul.f32 %v1341_v16, %v286_v8 }
  0xf3   : > { %v406_v18 = vsel %vm391_vm4, %v403_v6, %v405_v7  ;;  %v469_v26 = vsel %vm454_vm5, %v466_v11, %v468_v12  ;;  %v310_v27 = vmul.f32 %v1335_v13, %v286_v8  ;;  %v373_v31 = vmul.f32 %v1337_v14, %v286_v8 }
  0xf4   : > { %v568_v24 = vmul.f32 %v1347_v22, %v1435_v9  ;;  %v425_v25 = vadd.f32 %v406_v18, %v362_v10  ;;  %v531_v30 = vrot.slane %v501_v19, 4  ;;  %v436_v35 = vmul.f32 %v1339_v15, %v286_v8 }
  0xf5   : > { %v499_v36 = vmul.f32 %v1343_v17, %v286_v8  ;;  %v339_v42 = vrot.slane %v310_v27, 1  ;;  %v314_v43 = vmul.f32 %v1335_v13, %v290_v23  ;;  %v402_v45 = vrot.slane %v373_v31, 2 }
  0xf6   : > { %586 = vrot.lane.b32.xlu0 %v568_v24, %s1135_s28  ;;  %v488_v38 = vadd.f32 %v469_v26, %v425_v25  ;;  %v532_v44 = vsel %vm517_vm6, %v529_v20, %v531_v30  ;;  %v465_v46 = vrot.slane %v436_v35, 3  ;;  %v301_v47 = vmul.f32 %v1341_v16, %v290_v23 }
  0xf7   : > { %v341_v49 = vsel %vm328_vm3, %v339_v42, %v340_v61  ;;  %v315_v50 = vmul.f32 %v1335_v13, %v291_v37  ;;  %v345_v51 = vrot.slane %v314_v43, 1  ;;  %v404_v53 = vsel %vm391_vm4, %v402_v45, %v403_v6 }
  0xf8   : > { %v1452_v48 = vadd.f32 %v532_v44, %v488_v38  ;;  %v361_v52 = vadd.f32 %v341_v49, %v298_v21  ;;  %v467_v54 = vsel %vm454_vm5, %v465_v46, %v466_v11  ;;  %v528_v55 = vrot.slane %v499_v36, 4 }
  0xf9   : > { %v347_v39 = vrot.slane %v315_v50, 1  ;;  %v377_v56 = vmul.f32 %v1337_v14, %v290_v23  ;;  %v378_v57 = vmul.f32 %v1337_v14, %v291_v37  ;;  %v440_v33 = vmul.f32 %v1339_v15, %v290_v23 }
  0xfa   : > { %v571_v29 = vmul.f32 %v1347_v22, %v1452_v48  ;;  %v424_v28 = vadd.f32 %v404_v53, %v361_v52  ;;  %v441_v58 = vmul.f32 %v1339_v15, %v291_v37  ;;  %v503_v59 = vmul.f32 %v1343_v17, %v290_v23 }
  0xfb   : > { %v348_v60 = vsel %vm328_vm3, %v345_v51, %v347_v39  ;;  %v408_v61 = vrot.slane %v377_v56, 2  ;;  %v410_v41 = vrot.slane %v378_v57, 2  ;;  %v504_v62 = vmul.f32 %v1343_v17, %v291_v37 }
  0xfc   : > { %592 = vrot.lane.b32.xlu1 %v571_v29, %s1135_s28  ;;  %v487_v0 = vadd.f32 %v467_v54, %v424_v28  ;;  %v364_v1 = vadd.f32 %v348_v60, %v301_v47  ;;  %v471_v2 = vrot.slane %v440_v33, 3  ;;  %v473_v3 = vrot.slane %v441_v58, 3 }
  0xfd   : > { %v530_v4 = vsel %vm517_vm6, %v528_v55, %v529_v20  ;;  %v411_v5 = vsel %vm391_vm4, %v408_v61, %v410_v41  ;;  %v534_v6 = vrot.slane %v503_v59, 4  ;;  %v536_v7 = vrot.slane %v504_v62, 4 }
  0xfe   : > { %v1470_v8 = vadd.f32 %v530_v4, %v487_v0  ;;  %v427_v10 = vadd.f32 %v411_v5, %v364_v1  ;;  %v474_v11 = vsel %vm454_vm5, %v471_v2, %v473_v3  ;;  %v313_v12 = vmul.f32 %v1335_v13, %v289_v63 }
  0xff   : > { %v300_v18 = vmul.f32 %v1341_v16, %v289_v63  ;;  %v376_v19 = vmul.f32 %v1337_v14, %v289_v63  ;;  %v439_v21 = vmul.f32 %v1339_v15, %v289_v63  ;;  %v502_v25 = vmul.f32 %v1343_v17, %v289_v63 }
 0x100   : > { %v570_v20 = vmul.f32 %v1347_v22, %v1470_v8  ;;  %v490_v23 = vadd.f32 %v474_v11, %v427_v10  ;;  %v344_v24 = vrot.slane %v313_v12, 1  ;;  %v537_v26 = vsel %vm517_vm6, %v534_v6, %v536_v7 }
 0x101   : > { %v407_v27 = vrot.slane %v376_v19, 2  ;;  %v470_v30 = vrot.slane %v439_v21, 3  ;;  %v533_v36 = vrot.slane %v502_v25, 4  ;;  %v615_v37 = vstv %s904_s5 }
 0x102   : > { %590 = vrot.lane.b32.xlu0 %v570_v20, %s1135_s28  ;;  %v1482_v13 = vadd.f32 %v537_v26, %v490_v23  ;;  %v346_v16 = vsel %vm328_vm3, %v344_v24, %v345_v51  ;;  %v617_v43 = vmul.f32 %v615_v37, %v1396_v32  ;;  %v619_v46 = vmul.f32 %v615_v37, %v1425_v40 }
 0x103   : > { %v363_v14 = vadd.f32 %v346_v16, %v300_v18  ;;  %v409_v15 = vsel %vm391_vm4, %v407_v27, %v408_v61  ;;  %v472_v35 = vsel %vm454_vm5, %v470_v30, %v471_v2  ;;  %v535_v42 = vsel %vm517_vm6, %v533_v36, %v534_v6 }
 0x104   : > { %v573_v31 = vmul.f32 %v1347_v22, %v1482_v13  ;;  %v616_v47 = vmul.f32 %v615_v37, %v1398_v34  ;;  %v621_v49 = vmul.f32 %v615_v37, %v1452_v48  ;;  %v618_v50 = vmul.f32 %v615_v37, %v1435_v9 }
 0x105   : > { %v426_v17 = vadd.f32 %v409_v15, %v363_v14  ;;  %v623_v51 = vmul.f32 %v615_v37, %v1482_v13  ;;  %v665_v52 = vstv %s905_s7  ;;  %v715_v28 = vstv %s906_s9 }
 0x106   : > { %596 = vrot.lane.b32.xlu1 %v573_v31, %s1135_s28  ;;  %v667_v53 = vmul.f32 %v665_v52, %v1396_v32  ;;  %v669_v55 = vmul.f32 %v665_v52, %v1425_v40  ;;  %v666_v29 = vmul.f32 %v665_v52, %v1398_v34  ;;  %v671_v39 = vmul.f32 %v665_v52, %v1452_v48 }
 0x107   : > { %v489_v38 = vadd.f32 %v472_v35, %v426_v17  ;;  %v668_v56 = vmul.f32 %v665_v52, %v1435_v9  ;;  %v673_v57 = vmul.f32 %v665_v52, %v1482_v13  ;;  %v670_v33 = vmul.f32 %v665_v52, %v1470_v8 }
 0x108   : > { %v717_v58 = vmul.f32 %v715_v28, %v1396_v32  ;;  %v719_v60 = vmul.f32 %v715_v28, %v1425_v40  ;;  %v716_v61 = vmul.f32 %v715_v28, %v1398_v34  ;;  %v721_v41 = vmul.f32 %v715_v28, %v1452_v48 }
 0x109   : > { %v1492_v44 = vadd.f32 %v535_v42, %v489_v38  ;;  %v718_v62 = vmul.f32 %v715_v28, %v1435_v9  ;;  %v723_v63 = vmul.f32 %v715_v28, %v1482_v13  ;;  %v720_v0 = vmul.f32 %v715_v28, %v1470_v8 }
 0x10a   : > { %634 = vrot.lane.b32.xlu1 %v617_v43, %s1136_s6  ;;  %v555_v30 = vstv %s554_s4 }
 0x10b   : > { %v572_v45 = vmul.f32 %v1347_v22, %v1492_v44  ;;  %v620_v22 = vmul.f32 %v615_v37, %v1470_v8  ;;  %v622_v54 = vmul.f32 %v615_v37, %v1492_v44  ;;  %v672_v59 = vmul.f32 %v665_v52, %v1492_v44 }
 0x10c   : > { %v722_v1 = vmul.f32 %v715_v28, %v1492_v44  ;;  %v557_v15 = vmul.f32 %v555_v30, %v1396_v32  ;;  %v559_v17 = vmul.f32 %v555_v30, %v1425_v40  ;;  %v558_v40 = vmul.f32 %v555_v30, %v1435_v9 }
 0x10d   : > { %594 = vrot.lane.b32.xlu0 %v572_v45, %s1135_s28  ;;  %v556_v45 = vmul.f32 %v555_v30, %v1398_v34  ;;  %s1058_s28 = scalar_lea.vmem %s1057_s27, 2048 }
 0x10e   : > { %638 = vrot.lane.b32.xlu1 %v619_v46, %s1136_s6  ;;  %p1060_p12 = scmp.lt.s32.totalorder %s1058_s28, %s1052_s16 }
 0x110   : > { %p1061_p7 = por %p1060_p12, %p1059_p6 }
 0x111   : > { %632 = vrot.lane.b32.xlu0 %v616_v47, %s1136_s6  ;;  %v561_v47 = vmul.f32 %v555_v30, %v1452_v48 }
 0x112   : > { %642 = vrot.lane.b32.xlu1 %v621_v49, %s1136_s6  ;;  %p1062_p9 = pnand %p1061_p7, %p1055_p10 }
 0x115   : > { %636 = vrot.lane.b32.xlu0 %v618_v50, %s1136_s6 }
 0x116   : > { %646 = vrot.lane.b32.xlu1 %v623_v51, %s1136_s6 }
 0x119   : > { %640 = vrot.lane.b32.xlu0 %v620_v22, %s1136_s6 }
 0x11a   : > { %684 = vrot.lane.b32.xlu1 %v667_v53, %s1137_s8 }
 0x11d   : > { %644 = vrot.lane.b32.xlu0 %v622_v54, %s1136_s6  ;;  %v563_v54 = vmul.f32 %v555_v30, %v1482_v13 }
 0x11e   : > { %688 = vrot.lane.b32.xlu1 %v669_v55, %s1137_s8 }
 0x121   : > { %682 = vrot.lane.b32.xlu0 %v666_v29, %s1137_s8 }
 0x122   : > { %692 = vrot.lane.b32.xlu1 %v671_v39, %s1137_s8 }
 0x125   : > { %686 = vrot.lane.b32.xlu0 %v668_v56, %s1137_s8 }
 0x126   : > { %696 = vrot.lane.b32.xlu1 %v673_v57, %s1137_s8 }
 0x129   : > { %690 = vrot.lane.b32.xlu0 %v670_v33, %s1137_s8  ;;  %v560_v33 = vmul.f32 %v555_v30, %v1470_v8  ;;  %v562_v8 = vmul.f32 %v555_v30, %v1492_v44 }
 0x12a   : > { %734 = vrot.lane.b32.xlu1 %v717_v58, %s1138_s11 }
 0x12d   : > { %694 = vrot.lane.b32.xlu0 %v672_v59, %s1137_s8 }
 0x12e   : > { %738 = vrot.lane.b32.xlu1 %v719_v60, %s1138_s11 }
 0x131   : > { %732 = vrot.lane.b32.xlu0 %v716_v61, %s1138_s11 }
 0x132   : > { %742 = vrot.lane.b32.xlu1 %v721_v41, %s1138_s11 }
 0x135   : > { %736 = vrot.lane.b32.xlu0 %v718_v62, %s1138_s11 }
 0x136   : > { %746 = vrot.lane.b32.xlu1 %v723_v63, %s1138_s11 }
 0x139   : > { %740 = vrot.lane.b32.xlu0 %v720_v0, %s1138_s11 }
 0x13d   : > { %744 = vrot.lane.b32.xlu0 %v722_v1, %s1138_s11 }
 0x15d   : > { %v585_v2 = vpop.permute.xlu1 %584 }
 0x15e   : > { %v583_v4 = vpop.permute.xlu0 %582  ;;  %v607_v31 = vadd.f32 %v585_v2, %v557_v15 }
 0x15f   : > { %v606_v51 = vadd.f32 %v583_v4, %v556_v45 }
 0x164   : > { %v589_v3 = vpop.permute.xlu1 %588 }
 0x165   : > { %v609_v38 = vadd.f32 %v589_v3, %v559_v17 }
 0x168   : > { %v587_v6 = vpop.permute.xlu0 %586 }
 0x169   : > { %v608_v29 = vadd.f32 %v587_v6, %v558_v40 }
 0x16e   : > { %v593_v5 = vpop.permute.xlu1 %592 }
 0x16f   : > { %v611_v32 = vadd.f32 %v593_v5, %v561_v47 }
 0x174   : > { %v591_v10 = vpop.permute.xlu0 %590 }
 0x175   : > { %v610_v13 = vadd.f32 %v591_v10, %v560_v33 }
 0x178   : > { %v597_v7 = vpop.permute.xlu1 %596 }
 0x179   : > { %v613_v56 = vadd.f32 %v597_v7, %v563_v54 }
 0x17c   : > { %v635_v11 = vpop.permute.xlu1 %634 }
 0x17d   : > { %v657_v37 = vadd.f32 %v635_v11, %v607_v31 }
 0x17f   : > { %v1520_v12 = vpop.permute.xlu0 %594 }
 0x180   : > { %v639_v18 = vpop.permute.xlu1 %638  ;;  %v612_v4 = vadd.f32 %v1520_v12, %v562_v8 }
 0x181   : > { %v659_v49 = vadd.f32 %v639_v18, %v609_v38 }
 0x183   : > { %v633_v19 = vpop.permute.xlu0 %632 }
 0x184   : > { %v643_v21 = vpop.permute.xlu1 %642  ;;  %v656_v34 = vadd.f32 %v633_v19, %v606_v51 }
 0x185   : > { %v661_v48 = vadd.f32 %v643_v21, %v611_v32 }
 0x187   : > { %v637_v20 = vpop.permute.xlu0 %636 }
 0x188   : > { %v647_v23 = vpop.permute.xlu1 %646  ;;  %v658_v58 = vadd.f32 %v637_v20, %v608_v29 }
 0x189   : > { %v663_v60 = vadd.f32 %v647_v23, %v613_v56 }
 0x18b   : > { %v641_v24 = vpop.permute.xlu0 %640 }
 0x18c   : > { %v685_v25 = vpop.permute.xlu1 %684  ;;  %v660_v0 = vadd.f32 %v641_v24, %v610_v13 }
 0x18d   : > { %v707_v42 = vadd.f32 %v685_v25, %v657_v37 }
 0x18f   : > { %v645_v26 = vpop.permute.xlu0 %644 }
 0x190   : > { %v689_v27 = vpop.permute.xlu1 %688  ;;  %v662_v7 = vadd.f32 %v645_v26, %v612_v4 }
 0x191   : > { %v709_v52 = vadd.f32 %v689_v27, %v659_v49 }
 0x193   : > { %v683_v16 = vpop.permute.xlu0 %682 }
 0x194   : > { %v693_v14 = vpop.permute.xlu1 %692  ;;  %v706_v39 = vadd.f32 %v683_v16, %v656_v34 }
 0x195   : > { %v711_v57 = vadd.f32 %v693_v14, %v661_v48 }
 0x197   : > { %v687_v35 = vpop.permute.xlu0 %686 }
 0x198   : > { %v697_v36 = vpop.permute.xlu1 %696  ;;  %v708_v41 = vadd.f32 %v687_v35, %v658_v58 }
 0x199   : > { %v713_v62 = vadd.f32 %v697_v36, %v663_v60 }
 0x19b   : > { %v691_v43 = vpop.permute.xlu0 %690 }
 0x19c   : > { %v735_v46 = vpop.permute.xlu1 %734  ;;  %v710_v5 = vadd.f32 %v691_v43, %v660_v0 }
 0x19d   : > { %v757_v50 = vadd.f32 %v735_v46, %v707_v42 }
 0x19f   : > { %v695_v22 = vpop.permute.xlu0 %694  ;;  %766 = vst.msk [vmem:[%s1528_s10 + $0x8] sm:$0xff] %vm764_vm7, %v757_v50 }
 0x1a0   : > { %v739_v53 = vpop.permute.xlu1 %738  ;;  %v712_v44 = vadd.f32 %v695_v22, %v662_v7 }
 0x1a1   : > { %v759_v55 = vadd.f32 %v739_v53, %v709_v52 }
 0x1a3   : > { %v733_v28 = vpop.permute.xlu0 %732  ;;  %768 = vst.msk [vmem:[%s1528_s10 + $0x18] sm:$0xff] %vm764_vm7, %v759_v55 }
 0x1a4   : > { %v756_v59 = vadd.f32 %v733_v28, %v706_v39  ;;  %v743_v9 = vpop.permute.xlu1 %742 }
 0x1a5   : > { %v761_v61 = vadd.f32 %v743_v9, %v711_v57 }
 0x1a6   : > { %765 = vst.msk [vmem:[%s1528_s10] sm:$0xff] %vm764_vm7, %v756_v59 }
 0x1a7   : > { %v737_v63 = vpop.permute.xlu0 %736  ;;  %770 = vst.msk [vmem:[%s1528_s10 + $0x28] sm:$0xff] %vm764_vm7, %v761_v61 }
 0x1a8   : > { %v758_v1 = vadd.f32 %v737_v63, %v708_v41  ;;  %v747_v2 = vpop.permute.xlu1 %746 }
 0x1a9   : > { %v763_v3 = vadd.f32 %v747_v2, %v713_v62 }
 0x1aa   : > { %767 = vst.msk [vmem:[%s1528_s10 + $0x10] sm:$0xff] %vm764_vm7, %v758_v1 }
 0x1ab   : > { %v741_v6 = vpop.permute.xlu0 %740  ;;  %772 = vst.msk [vmem:[%s1528_s10 + $0x38] sm:$0xff] %vm764_vm7, %v763_v3 }
 0x1ac   : > { %v760_v10 = vadd.f32 %v741_v6, %v710_v5 }
 0x1ae   : > { %769 = vst.msk [vmem:[%s1528_s10 + $0x20] sm:$0xff] %vm764_vm7, %v760_v10 }
 0x1af   : > { %v745_v11 = vpop.permute.xlu0 %744 }
 0x1b0   : > { %v762_v12 = vadd.f32 %v745_v11, %v712_v44 }
 0x1b2   : > { %771 = vst.msk [vmem:[%s1528_s10 + $0x30] sm:$0xff] %vm764_vm7, %v762_v12 }
 0x1b3   : > { %1065 = shalt.err (!%p1062_p9)
}
 0x1b4   : > { %s1066_s5 = scalar_lea.hbm %s1554_s29, 1024  ;;  %s1070_s8 = scalar_lea.hbm %s1605_s3, 2048 }
 0x1b5   : > { %p1067_p2 = scmp.ne.s32.totalorder %s1554_s29, %s1066_s5  ;;  %p1071_p4 = scmp.lt.u32.totalorder %s1554_s29, %s1605_s3 }
 0x1b6   : > { %p1072_p5 = scmp.lt.u32.totalorder %s1070_s8, %s1066_s5  ;;  %p1074_p3 = scmp.lt.u32.totalorder %s1066_s5, %s1554_s29 }
 0x1b7   : > { %p1068_p11 = pnand %p1067_p2, %p1622_p0 }
 0x1b8   : > { %p1073_p13 = por %p1072_p5, %p1071_p4 }
 0x1b9   : > { %p1069_p1 = pneg %p1068_p11 }
 0x1ba   : > { %p1075_p8 = por %p1074_p3, %p1073_p13 }
 0x1bc   : > { %p1076_p10 = pnand %p1075_p8, %p1069_p1 }
 0x1be   : > { %1079 = shalt.err (!%p1076_p10)
}
 0x1bf   : > { %s1140_s4 = smov 128   ;;  %s1141_s10 = smov 8  }
 0x1c0   : > { %927 = dma.vmem_to_hbm [thread:$0]  (%p1622_p0), %s1556_s17, 1024, %s1554_s29, %s774_s20, %s1140_s4, %s1140_s4, %s1141_s10  }
 0x1c1 PF: > { %s803_s26 = sand.u32 1, %s1114_s12   ;;  %p1623_p6 = scmp.ne.s32.totalorder %s1612_s25, 0 }
 0x1c2   : > { %p1624_p12 = scmp.ge.s32.totalorder %s1126_s15, 2  ;;  %s804_s23 = scalar_lea.sflag [#allocation5], %s803_s26 }
 0x1c4   : > { %p941_p7 = pnand %p1624_p12, %p1623_p6 }
 0x1c6   : > { %1109 = dma.done.wait (!%p941_p7), %s804_s23, 1024  }
 0x1c7   : > { %1111 = vsyncadd (!%p941_p7), %s804_s23, 4294966272  ;;  %p18_p9 = scmp.ge.s32.totalorder %s1187_s18, 4   ;;  %s1625_s12 = smov %s1118_s13 }
 0x1c8   : > { %s1626_s13 = smov %s1122_s14  ;;  %s1627_s14 = smov %s1199_s21 }
 0x1c9   : > { %s1628_s15 = smov %s1187_s18  ;;  %20 = sbr.rel (!%p18_p9) target bundleno = 7 (0x7), region = 87 }
 0x1d0   :  { %809 = vsyncpa [#allocation4], 1 }
 0x1d1   :  { %811 = vsyncpa [#allocation4 + $0x1], 1 }
 0x1d2   :  { %812 = vsyncpa [#allocation5], 1 }
 0x1d3   :  { %814 = vsyncpa [#allocation5 + $0x1], 1 }
 0x1d4   :  { %815 = vsyncpa [#allocation6], 1 }
 0x1d5   :  { %817 = vsyncpa [#allocation6 + $0x1], 1 }
 0x1d6   :  { %818 = vsyncpa [#allocation7], 1 }
 0x1d7   :  { %820 = vsyncpa [#allocation7 + $0x1], 1 }

</bundles_post_ra>
